<compile_context>
chip_gen: v7x
topology: tpu7x:2x2x1
jax: 0.10.0
libtpu: 0.0.40
codegen_flags: <defaults>
</compile_context>

<pallas_src>
import jax
import jax.numpy as jnp
from jax.experimental import pallas as pl
from jax.experimental.pallas import tpu as pltpu

LANE = 128  # pad channel/class dims to full lane width for unmasked stores


def engine_kernel(patches_ref, wc_ref, bc_ref, wf_ref, bf_ref, out_ref):
    # patches_ref: [1, P, K]   bf16  (one sample per grid step)
    # wc_ref:      [K, 128]    bf16  (im2col conv weight, Cout zero-padded)
    # bc_ref:      [1, 128]    f32   (conv bias, zero-padded)
    # wf_ref:      [128, 128]  f32   (classifier weight, zero-padded)
    # bf_ref:      [1, 128]    f32   (classifier bias, zero-padded)
    # out_ref:     [1, 1, 128] f32   (padded logits)
    patches = patches_ref[0]                              # [P, K] bf16
    P = patches.shape[0]

    # conv as a single lane-dense MXU matmul, f32 accumulation
    h = jnp.dot(patches, wc_ref[...],
                preferred_element_type=jnp.float32)       # [P, 128] f32
    # bias + ReLU on the VPU (operands already lane-dense, unmasked)
    h = jnp.maximum(h + bc_ref[...], 0.0)

    # global average pool as a matmul -> rides the already-open MXU stream
    pool_vec = jnp.full((1, P), 1.0 / P, dtype=jnp.float32)
    pooled = jnp.dot(pool_vec, h,
                     preferred_element_type=jnp.float32)  # [1, 128]

    # classifier head
    logits = jnp.dot(pooled, wf_ref[...],
                     preferred_element_type=jnp.float32) + bf_ref[...]
    out_ref[0] = logits.astype(out_ref.dtype)             # [1, 128] store


def torch_engine_forward(x_nchw, wc, bc, wf, bf):
    """x_nchw: [N, Cin, H, W] float32 (PyTorch layout). Returns logits [N, num_classes]."""
    N, Cin, H, W = x_nchw.shape
    Cout = wc.shape[0]
    num_classes = wf.shape[1]
    P = H * W
    K = 9 * Cin

    # --- data prep (XLA side): NCHW -> NHWC, zero-pad, im2col -> [N, P, K] ---
    # TODO(synk): for large H*W, move im2col into the kernel (DMA the padded
    # NHWC input and build the 9 shifted views in VMEM / tile over P) to avoid
    # the 9x HBM expansion of `patches`; bf16 already halves its DMA bytes.
    x_nhwc = jnp.transpose(x_nchw, (0, 2, 3, 1))
    xp = jnp.pad(x_nhwc, ((0, 0), (1, 1), (1, 1), (0, 0)))
    cols = []
    for di in range(3):
        for dj in range(3):
            cols.append(xp[:, di:di + H, dj:dj + W, :])
    patches = jnp.stack(cols, axis=3).reshape(N, P, K)
    patches = patches.astype(jnp.bfloat16)                # bf16 matmul operand

    # conv weight (Cout, Cin, 3, 3) -> (kh, kw, cin) x Cout, zero-padded to 128
    # lanes; ordering matches the patch layout built above.
    wc_mat = jnp.transpose(wc, (2, 3, 1, 0)).reshape(K, Cout)
    wc_pad = jnp.zeros((K, LANE), jnp.float32).at[:, :Cout].set(wc_mat)
    wc_pad = wc_pad.astype(jnp.bfloat16)
    bc_pad = jnp.zeros((1, LANE), jnp.float32).at[0, :Cout].set(bc)
    wf_pad = jnp.zeros((LANE, LANE), jnp.float32).at[:Cout, :num_classes].set(wf)
    bf_pad = jnp.zeros((1, LANE), jnp.float32).at[0, :num_classes].set(bf)

    out = pl.pallas_call(
        engine_kernel,
        out_shape=jax.ShapeDtypeStruct((N, 1, LANE), jnp.float32),
        grid_spec=pltpu.PrefetchScalarGridSpec(
            num_scalar_prefetch=0,
            grid=(N,),  # one sample per grid step; pipelined + TC-shardable
            in_specs=[
                pl.BlockSpec((1, P, K), lambda n: (n, 0, 0)),
                # constant block indices -> weights/biases stay VMEM-resident
                pl.BlockSpec((K, LANE), lambda n: (0, 0)),
                pl.BlockSpec((1, LANE), lambda n: (0, 0)),
                pl.BlockSpec((LANE, LANE), lambda n: (0, 0)),
                pl.BlockSpec((1, LANE), lambda n: (0, 0)),
            ],
            out_specs=pl.BlockSpec((1, 1, LANE), lambda n: (n, 0, 0)),
        ),
        compiler_params=pltpu.CompilerParams(
            dimension_semantics=("parallel",),   # use both TCs on v7x
            vmem_limit_bytes=32 * 1024 * 1024,
        ),
    )(patches, wc_pad, bc_pad, wf_pad, bf_pad)

    # slice the lane padding back off
    return out[:, 0, :num_classes]


if __name__ == "__main__":
    key = jax.random.PRNGKey(0)
    k1, k2, k3, k4, k5 = jax.random.split(key, 5)

    N, Cin, H, W = 2, 4, 16, 16
    Cout, num_classes = 32, 16

    # deterministic synthetic parameters (shapes follow the PyTorch module)
    x = jax.random.normal(k1, (N, Cin, H, W), jnp.float32)
    wc = jax.random.normal(k2, (Cout, Cin, 3, 3), jnp.float32) * 0.1   # Conv2d weight
    bc = jax.random.normal(k3, (Cout,), jnp.float32) * 0.1             # Conv2d bias
    wf = jax.random.normal(k4, (Cout, num_classes), jnp.float32) * 0.1 # Linear weight (in,out)
    bf = jax.random.normal(k5, (num_classes,), jnp.float32) * 0.1      # Linear bias

    logits = torch_engine_forward(x, wc, bc, wf, bf)
    jax.block_until_ready(logits)

    # pure-JAX f32 reference with identical semantics to the PyTorch forward
    conv = jax.lax.conv_general_dilated(
        x, wc, window_strides=(1, 1), padding=((1, 1), (1, 1)),
        dimension_numbers=("NCHW", "OIHW", "NCHW"))
    h_ref = jnp.maximum(conv + bc[None, :, None, None], 0.0)
    pooled_ref = h_ref.mean(axis=(2, 3))
    ref = pooled_ref @ wf + bf
    # tolerance loosened slightly for the bf16 matmul operands (f32 accumulation)
    assert jnp.allclose(logits, ref, atol=2e-2, rtol=2e-2), (
        "max abs diff = %f" % float(jnp.max(jnp.abs(logits - ref))))

    # TODO(synk): train_one_epoch / validate (optimizer step, loss.backward,
    # data-loader loop, DDP) are host-side training-loop logic, not a kernel path.
    print("KERNEL_OK")
</pallas_src>

<mosaic_0001>
module attributes {stable_mosaic.version = 11 : i64} {
  func.func @engine_kernel(%arg0: i32, %arg1: memref<1x256x36xbf16, #tpu.memory_space<vmem>>, %arg2: memref<36x128xbf16, #tpu.memory_space<vmem>>, %arg3: memref<1x128xf32, #tpu.memory_space<vmem>>, %arg4: memref<128x128xf32, #tpu.memory_space<vmem>>, %arg5: memref<1x128xf32, #tpu.memory_space<vmem>>, %arg6: memref<1x1x128xf32, #tpu.memory_space<vmem>>) attributes {dimension_semantics = [#tpu.dimension_semantics<parallel>], iteration_bounds = array<i64: 2>, scalar_prefetch = 0 : i64, scratch_operands = 0 : i64, tpu.core_type = #tpu.core_type<tc>, window_params = [{transform_indices = @transform_0, window_bounds = array<i64: 1, 256, 36>}, {pipeline_mode = #tpu.pipeline_mode<synchronous>, transform_indices = @transform_1, window_bounds = array<i64: 36, 128>}, {pipeline_mode = #tpu.pipeline_mode<synchronous>, transform_indices = @transform_2, window_bounds = array<i64: 1, 128>}, {pipeline_mode = #tpu.pipeline_mode<synchronous>, transform_indices = @transform_3, window_bounds = array<i64: 128, 128>}, {pipeline_mode = #tpu.pipeline_mode<synchronous>, transform_indices = @transform_4, window_bounds = array<i64: 1, 128>}, {transform_indices = @transform_5, window_bounds = array<i64: 1, 1, 128>}]} {
    %c0 = arith.constant 0 : index
    %c0_0 = arith.constant 0 : index
    %c0_1 = arith.constant 0 : index
    %0 = vector.load %arg1[%c0, %c0_0, %c0_1] : memref<1x256x36xbf16, #tpu.memory_space<vmem>>, vector<1x256x36xbf16>
    %1 = vector.shape_cast %0 : vector<1x256x36xbf16> to vector<256x36xbf16>
    %c0_2 = arith.constant 0 : index
    %c0_3 = arith.constant 0 : index
    %2 = vector.load %arg2[%c0_2, %c0_3] : memref<36x128xbf16, #tpu.memory_space<vmem>>, vector<36x128xbf16>
    %cst = arith.constant dense<0.000000e+00> : vector<256x128xf32>
    %3 = tpu.matmul %1, %2, %cst {dimension_numbers = #tpu.dot_dimension_numbers<[1], [0], [0], [1], [0, 0, 1, 1], [], []>} : vector<256x36xbf16>, vector<36x128xbf16>, vector<256x128xf32> -> vector<256x128xf32>
    %c0_4 = arith.constant 0 : index
    %c0_5 = arith.constant 0 : index
    %4 = vector.load %arg3[%c0_4, %c0_5] : memref<1x128xf32, #tpu.memory_space<vmem>>, vector<1x128xf32>
    %5 = vector.broadcast %4 : vector<1x128xf32> to vector<256x128xf32>
    %6 = arith.addf %3, %5 : vector<256x128xf32>
    %cst_6 = arith.constant 0.000000e+00 : f32
    %7 = vector.broadcast %cst_6 : f32 to vector<256x128xf32>
    %8 = arith.maximumf %6, %7 : vector<256x128xf32>
    %cst_7 = arith.constant 3.906250e-03 : f32
    %9 = vector.broadcast %cst_7 : f32 to vector<1x256xf32>
    %cst_8 = arith.constant dense<0.000000e+00> : vector<1x128xf32>
    %10 = tpu.matmul %9, %8, %cst_8 {dimension_numbers = #tpu.dot_dimension_numbers<[1], [0], [0], [1], [0, 0, 1, 1], [], []>} : vector<1x256xf32>, vector<256x128xf32>, vector<1x128xf32> -> vector<1x128xf32>
    %c0_9 = arith.constant 0 : index
    %c0_10 = arith.constant 0 : index
    %11 = vector.load %arg4[%c0_9, %c0_10] : memref<128x128xf32, #tpu.memory_space<vmem>>, vector<128x128xf32>
    %cst_11 = arith.constant dense<0.000000e+00> : vector<1x128xf32>
    %12 = tpu.matmul %10, %11, %cst_11 {dimension_numbers = #tpu.dot_dimension_numbers<[1], [0], [0], [1], [0, 0, 1, 1], [], []>} : vector<1x128xf32>, vector<128x128xf32>, vector<1x128xf32> -> vector<1x128xf32>
    %c0_12 = arith.constant 0 : index
    %c0_13 = arith.constant 0 : index
    %13 = vector.load %arg5[%c0_12, %c0_13] : memref<1x128xf32, #tpu.memory_space<vmem>>, vector<1x128xf32>
    %14 = arith.addf %12, %13 : vector<1x128xf32>
    %c0_14 = arith.constant 0 : index
    %c0_15 = arith.constant 0 : index
    %c0_16 = arith.constant 0 : index
    %15 = vector.load %arg6[%c0_14, %c0_15, %c0_16] : memref<1x1x128xf32, #tpu.memory_space<vmem>>, vector<1x1x128xf32>
    %16 = vector.shape_cast %15 : vector<1x1x128xf32> to vector<1x128xf32>
    %17 = vector.shape_cast %14 : vector<1x128xf32> to vector<1x1x128xf32>
    tpu.vector_store %arg6[%c0_14, %c0_15, %c0_16], %17 {strides = array<i32>} : memref<1x1x128xf32, #tpu.memory_space<vmem>>, vector<1x1x128xf32>,
    return
  }
  func.func @transform_0(%arg0: i32) -> (i32, i32, i32) {
    %c0_i32 = arith.constant 0 : i32
    %c0_i32_0 = arith.constant 0 : i32
    %c0_i32_1 = arith.constant 0 : i32
    return %arg0, %c0_i32, %c0_i32_0 : i32, i32, i32
  }
  func.func @transform_1(%arg0: i32) -> (i32, i32) {
    %c0_i32 = arith.constant 0 : i32
    %c0_i32_0 = arith.constant 0 : i32
    %c0_i32_1 = arith.constant 0 : i32
    return %c0_i32, %c0_i32_0 : i32, i32
  }
  func.func @transform_2(%arg0: i32) -> (i32, i32) {
    %c0_i32 = arith.constant 0 : i32
    %c0_i32_0 = arith.constant 0 : i32
    %c0_i32_1 = arith.constant 0 : i32
    return %c0_i32, %c0_i32_0 : i32, i32
  }
  func.func @transform_3(%arg0: i32) -> (i32, i32) {
    %c0_i32 = arith.constant 0 : i32
    %c0_i32_0 = arith.constant 0 : i32
    %c0_i32_1 = arith.constant 0 : i32
    return %c0_i32, %c0_i32_0 : i32, i32
  }
  func.func @transform_4(%arg0: i32) -> (i32, i32) {
    %c0_i32 = arith.constant 0 : i32
    %c0_i32_0 = arith.constant 0 : i32
    %c0_i32_1 = arith.constant 0 : i32
    return %c0_i32, %c0_i32_0 : i32, i32
  }
  func.func @transform_5(%arg0: i32) -> (i32, i32, i32) {
    %c0_i32 = arith.constant 0 : i32
    %c0_i32_0 = arith.constant 0 : i32
    %c0_i32_1 = arith.constant 0 : i32
    return %arg0, %c0_i32, %c0_i32_0 : i32, i32, i32
  }
}

</mosaic_0001>

<bundles_post_ra>
// kernel: tpu_custom_call.1
= control target key start
LH: loop header
LB: loop body
LE: loop exit
PB: predicated region body
PF: predicated region fallthrough
CT: control target
= control target key end

     0   :  { %10 = vsyncpa [#allocation3], 0  ;;  %s1499_s0 = inlined_call_operand.vmem [shape: bf16[2,256,36], index: 0, kind: input, shape index: {}]   ;;  %s1500_s1 = inlined_call_operand.vmem [shape: bf16[36,128], index: 1, kind: input, shape index: {}]   ;;  %s1501_s2 = inlined_call_operand.vmem [shape: f32[1,128], index: 2, kind: input, shape index: {}]   ;;  %s1502_s3 = inlined_call_operand.vmem [shape: f32[128,128], index: 3, kind: input, shape index: {}]   ;;  %s1503_s4 = inlined_call_operand.vmem [shape: f32[1,128], index: 4, kind: input, shape index: {}]   ;;  %s1504_s5 = inlined_call_operand.hbm [shape: f32[2,1,128], index: 5, kind: output, shape index: {}]  }
   0x1   :  { %12 = vsyncpa [#allocation3 + $0x1], 0  ;;  %s1242_s18 = smov 0   ;;  %s1244_s19 = smov 0  }
   0x2   :  { %s1246_s20 = smov 0   ;;  %s1248_s21 = smov 0  }
   0x3 LB: > { %s1263_s22 = sadd.s32 4294967295, %s1205_s21   ;;  %s834_s23 = sadd.s32 4294967294, %s1205_s21   ;;  %s1205_s21 = sphi %s1248_s21, %s1510_s21   ;;  %s1201_s20 = sphi %s1246_s20, %s1509_s20   ;;  %s1197_s19 = sphi %s1244_s19, %s1508_s19   ;;  %s1193_s18 = sphi %s1242_s18, %s1507_s18  }
   0x4   : > { %s1267_s24 = sadd.s32 1, %s1205_s21   ;;  %s135_s25 = sadd.s32 1, %s1201_s20 }
   0x5   : > { %s132_s26 = ssub.s32 %s1205_s21, %s1267_s24  ;;  %p145_p0 = scmp.ne.s32.totalorder %s1201_s20, %s1197_s19 }
   0x6   : > { %p133_p1 = scmp.eq.s32.totalorder %s132_s26, 0  ;;  %p146_p2 = scmp.eq.s32.totalorder %s1263_s22, 1 }
   0x7   : > { %p151_p3 = scmp.ne.s32.totalorder %s1197_s19, %s1193_s18  ;;  %p152_p4 = scmp.eq.s32.totalorder %s834_s23, 1 }
   0x8   : > { %s1278_s27 = scalar_select %p133_p1, %s1201_s20, %s135_s25  }
   0x9   : > { %p1280_p5 = por %p146_p2, %p145_p0  ;;  %p1284_p6 = por %p152_p4, %p151_p3 }
   0xa   : > { %p837_p7 = scmp.ge.s32.totalorder %s1205_s21, 1  ;;  %p190_p8 = scmp.lt.s32.totalorder %s1205_s21, 3 }
   0xc   : > { %p191_p9 = pnand %p837_p7, %p190_p8 }
   0xd   : > { %v1124_v0 = vld [vmem:[%s1500_s1] sm:$0xff] (!%p191_p9)   ;;  %v1125_v1 = vld [vmem:[%s1500_s1 + $0x8] sm:$0xff] (!%p191_p9)   ;;  %p217_p10 = scmp.lt.s32.totalorder (!%p191_p9), %s1263_s22, 1  ;;  %v1126_v2 = vld [vmem:[%s1500_s1 + $0x10] ss:$0 sps:$4 sm:$0x33] (!%p191_p9)  }
   0xe   : > { %194 = sbr.rel (%p191_p9) target bundleno = 755 (0x2f3), region = 40  ;;  %951 = vmatprep.subr.bf16.mxu0 (!%p191_p9), %v1124_v0  ;;  %vm411_vm0 = vcmask (!%p191_p9), 1041408   ;;  %vm362_vm1 = vcmask (!%p191_p9), 293888   ;;  %v1207_v20 = vmov (!%p191_p9), 0.00390625   ;;  %v1342_v21 = vld [vmem:[%s1501_s2] ss:$0 sm:$0xff] (!%p191_p9) }
   0xf   : > { %952 = vmatpush3.bf16.msra.mxu0 (!%p191_p9), %v1124_v0  ;;  %v413_v4 = vsel (!%p191_p9), %vm411_vm0, %v1126_v2, 0  ;;  %672 = vmatprep.mubr.f32.mxu1 (!%p191_p9), %v1207_v20  ;;  %vm1209_vm2 = vmmov (!%p191_p9), 0   ;;  %s215_s23 = sand.u32 (!%p191_p9), 1, %s1197_s19   ;;  %s876_s30 = sshll.u32 (!%p191_p9), %s1263_s22, 4 }
  0x10   : > { %953 = vmatprep.subr.bf16.mxu0 (!%p191_p9), %v1125_v1  ;;  %s216_s6 = scalar_lea.vmem (!%p191_p9), [#allocation2], %s215_s23  ;;  %s1457_s10 = scalar_lea.hbm (!%p191_p9), %s1504_s5, %s876_s30 }
  0x11   : > { %s779_s7 = sshll.u32 (!%p191_p9), %s216_s6, 4  ;;  %s767_s11 = scalar_lea.sflag (!%p191_p9), [#allocation3], %s215_s23  ;;  %s1459_s7 = int_to_ptr.vmem [resolvable:$true] %s779_s7 }
  0x13   : > { %954 = vmatpush3.bf16.msra.mxu0 (!%p191_p9), %v1125_v1 }
  0x14   : > { %1080 = vmatprep.subr.msk.bf16.mxu0 (!%p191_p9), %vm411_vm0, %v1126_v2 }
  0x15   : > { %s218_s9 = scalar_select %p217_p10, %s1263_s22, 1 }
  0x16   : > { %s1211_s22 = smov [#allocation2]  }
  0x17   : > { %s879_s12 = sshll.u32 %s218_s9, 7  ;;  %956 = vmatpush3.bf16.msra.mxu0 %v413_v4  ;;  %s1147_s13 = sshll.u32 %s1211_s22, 4  ;;  %s1148_s13 = int_to_ptr.vmem [resolvable:$false] %s1147_s13 }
  0x18   : > { %s1304_s15 = scalar_lea.vmem %s1499_s0, %s879_s12  ;;  %s1143_s12 = scalar_lea.vmem %s1459_s7, 16 }
  0x19   : > { %v1127_v3 = vld [vmem:[%s1304_s15] sm:$0xff]   ;;  %v1128_v5 = vld [vmem:[%s1304_s15 + $0x8] sm:$0xff]   ;;  %v1129_v6 = vld [vmem:[%s1304_s15 + $0x10] sm:$0xff]   ;;  %p1144_p11 = scmp.ne.s32.totalorder %s1459_s7, %s1143_s12  ;;  %s1149_s14 = scalar_lea.vmem %s1148_s13, 32 }
  0x1a   : > { %957 = vmatprep.mubr.msk.bf16.mxu0 %vm362_vm1, %v1127_v3  ;;  %v1130_v7 = vld [vmem:[%s1304_s15 + $0x18] sm:$0xff]   ;;  %v1131_v8 = vld [vmem:[%s1304_s15 + $0x20] sm:$0xff]   ;;  %v1132_v9 = vld [vmem:[%s1304_s15 + $0x28] sm:$0xff]   ;;  %p1150_p0 = scmp.lt.s32.totalorder %s1459_s7, %s1148_s13  ;;  %p1151_p1 = scmp.lt.s32.totalorder %s1149_s14, %s1143_s12 }
  0x1b   : > { %958 = vmatmul.mubr.msk.bf16.vlgmr.msra.gmra.mrb[0].mxu0 %vm362_vm1, %v1128_v5  ;;  %v1133_v10 = vld [vmem:[%s1304_s15 + $0x30] sm:$0xff]   ;;  %v1134_v11 = vld [vmem:[%s1304_s15 + $0x38] sm:$0xff]   ;;  %v1135_v12 = vld [vmem:[%s1304_s15 + $0x40] sm:$0xff]   ;;  %p1145_p12 = pnand %p1144_p11, %p1280_p5 }
  0x1c   : > { %961 = vmatprep.mubr.msk.bf16.mxu0 %vm362_vm1, %v1129_v6  ;;  %v1136_v13 = vld [vmem:[%s1304_s15 + $0x48] sm:$0xff]   ;;  %v1137_v14 = vld [vmem:[%s1304_s15 + $0x50] sm:$0xff]   ;;  %v1138_v15 = vld [vmem:[%s1304_s15 + $0x58] sm:$0xff]   ;;  %p1152_p2 = por %p1151_p1, %p1150_p0 }
  0x1d   : > { %v1139_v16 = vld [vmem:[%s1304_s15 + $0x60] sm:$0xff]   ;;  %v1140_v17 = vld [vmem:[%s1304_s15 + $0x68] sm:$0xff]   ;;  %v1141_v18 = vld [vmem:[%s1304_s15 + $0x70] sm:$0xff]   ;;  %p1146_p13 = pneg %p1145_p12 }
  0x1e   : > { %v1142_v19 = vld [vmem:[%s1304_s15 + $0x78] sm:$0xff]  }
  0x1f   : > { %p1153_p3 = pnand %p1152_p2, %p1146_p13 }
  0x23   : > { %962 = vmatmul.mubr.msk.bf16.gmra.mrb[4].mxu0 %vm362_vm1, %v1130_v7 }
  0x24   : > { %965 = vmatprep.mubr.msk.bf16.mxu0 %vm362_vm1, %v1131_v8 }
  0x2b   : > { %966 = vmatmul.mubr.msk.bf16.gmra.mrb[8].mxu0 %vm362_vm1, %v1132_v9 }
  0x2c   : > { %969 = vmatprep.mubr.msk.bf16.mxu0 %vm362_vm1, %v1133_v10 }
  0x33   : > { %970 = vmatmul.mubr.msk.bf16.gmra.mrb[12].mxu0 %vm362_vm1, %v1134_v11 }
  0x34   : > { %973 = vmatprep.mubr.msk.bf16.mxu0 %vm362_vm1, %v1135_v12 }
  0x3b   : > { %974 = vmatmul.mubr.msk.bf16.gmra.mrb[16].mxu0 %vm362_vm1, %v1136_v13 }
  0x3c   : > { %977 = vmatprep.mubr.msk.bf16.mxu0 %vm362_vm1, %v1137_v14 }
  0x43   : > { %978 = vmatmul.mubr.msk.bf16.gmra.mrb[20].mxu0 %vm362_vm1, %v1138_v15 }
  0x44   : > { %981 = vmatprep.mubr.msk.bf16.mxu0 %vm362_vm1, %v1139_v16 }
  0x4b   : > { %982 = vmatmul.mubr.msk.bf16.gmra.mrb[24].mxu0 %vm362_vm1, %v1140_v17 }
  0x4c   : > { %985 = vmatprep.mubr.msk.bf16.mxu0 %vm362_vm1, %v1141_v18 }
  0x53   : > { %986 = vmatmul.mubr.msk.bf16.gmra.mrb[28].mxu0 %vm362_vm1, %v1142_v19 }
  0xee   : > { %v959_v22 = vpop.f32.mrb[0].mxu0 }
  0xef   : > { %v458_v23 = vadd.f32 %v959_v22, %v1342_v21  ;;  %v449_v24 = vpop.f32.mrb[1].mxu0 }
  0xf0   : > { %v450_v25 = vadd.f32 %v1342_v21, %v449_v24  ;;  %v960_v26 = vpop.f32.mrb[2].mxu0 }
  0xf1   : > { %v461_v27 = vadd.f32 %v960_v26, %v1342_v21  ;;  %v452_v28 = vpop.f32.mrb[3].mxu0  ;;  %v578_v30 = vmax.f32 %v458_v23, 0.0 }
  0xf2   : > { %v453_v29 = vadd.f32 %v1342_v21, %v452_v28  ;;  %v576_v32 = vmax.f32 %v450_v25, 0.0 }
  0xf3   : > { %v579_v31 = vmax.f32 %v461_v27, 0.0 }
  0xf4   : > { %v577_v33 = vmax.f32 %v453_v29, 0.0 }
  0xf5   : > { %v1348_v34 = vpack.c.bf16 %v579_v31, %v578_v30 }
  0xf6   : > { %v963_v35 = vpop.f32.mrb[4].mxu0  ;;  %v1350_v36 = vpack.c.bf16 %v577_v33, %v576_v32 }
  0xf7   : > { %v474_v37 = vadd.f32 %v963_v35, %v1342_v21  ;;  %v465_v38 = vpop.f32.mrb[5].mxu0 }
  0xf8   : > { %v466_v39 = vadd.f32 %v1342_v21, %v465_v38  ;;  %v964_v40 = vpop.f32.mrb[6].mxu0 }
  0xf9   : > { %v477_v41 = vadd.f32 %v964_v40, %v1342_v21  ;;  %v468_v42 = vpop.f32.mrb[7].mxu0  ;;  %v582_v44 = vmax.f32 %v474_v37, 0.0 }
  0xfa   : > { %v469_v43 = vadd.f32 %v1342_v21, %v468_v42  ;;  %v580_v46 = vmax.f32 %v466_v39, 0.0 }
  0xfb   : > { %v583_v45 = vmax.f32 %v477_v41, 0.0 }
  0xfc   : > { %v581_v47 = vmax.f32 %v469_v43, 0.0 }
  0xfd   : > { %v1356_v48 = vpack.c.bf16 %v583_v45, %v582_v44 }
  0xfe   : > { %v1358_v49 = vpack.c.bf16 %v581_v47, %v580_v46  ;;  %v967_v50 = vpop.f32.mrb[8].mxu0 }
  0xff   : > { %v490_v51 = vadd.f32 %v967_v50, %v1342_v21  ;;  %v481_v52 = vpop.f32.mrb[9].mxu0 }
 0x100   : > { %v482_v53 = vadd.f32 %v1342_v21, %v481_v52  ;;  %v968_v54 = vpop.f32.mrb[10].mxu0 }
 0x101   : > { %v493_v55 = vadd.f32 %v968_v54, %v1342_v21  ;;  %v484_v56 = vpop.f32.mrb[11].mxu0  ;;  %v586_v58 = vmax.f32 %v490_v51, 0.0 }
 0x102   : > { %v485_v57 = vadd.f32 %v1342_v21, %v484_v56  ;;  %v584_v60 = vmax.f32 %v482_v53, 0.0 }
 0x103   : > { %v587_v59 = vmax.f32 %v493_v55, 0.0 }
 0x104   : > { %v585_v61 = vmax.f32 %v485_v57, 0.0 }
 0x105   : > { %v1364_v62 = vpack.c.bf16 %v587_v59, %v586_v58 }
 0x106   : > { %v1366_v63 = vpack.c.bf16 %v585_v61, %v584_v60  ;;  %v971_v0 = vpop.f32.mrb[12].mxu0 }
 0x107   : > { %v506_v1 = vadd.f32 %v971_v0, %v1342_v21  ;;  %v497_v2 = vpop.f32.mrb[13].mxu0 }
 0x108   : > { %v498_v3 = vadd.f32 %v1342_v21, %v497_v2  ;;  %v972_v4 = vpop.f32.mrb[14].mxu0 }
 0x109   : > { %v509_v5 = vadd.f32 %v972_v4, %v1342_v21  ;;  %v500_v6 = vpop.f32.mrb[15].mxu0  ;;  %v590_v8 = vmax.f32 %v506_v1, 0.0 }
 0x10a   : > { %v501_v7 = vadd.f32 %v1342_v21, %v500_v6  ;;  %v588_v10 = vmax.f32 %v498_v3, 0.0 }
 0x10b   : > { %v591_v9 = vmax.f32 %v509_v5, 0.0 }
 0x10c   : > { %v589_v11 = vmax.f32 %v501_v7, 0.0 }
 0x10d   : > { %v1372_v12 = vpack.c.bf16 %v591_v9, %v590_v8 }
 0x10e   : > { %v1374_v13 = vpack.c.bf16 %v589_v11, %v588_v10  ;;  %v975_v14 = vpop.f32.mrb[16].mxu0  ;;  %v678_v10 = vld [vmem:[%s1502_s3] sm:$0xff]  ;;  %v1208_v11 = vmov 0.0|0.0  }
 0x10f   : > { %v522_v15 = vadd.f32 %v975_v14, %v1342_v21  ;;  %v513_v16 = vpop.f32.mrb[17].mxu0 }
 0x110   : > { %v514_v17 = vadd.f32 %v1342_v21, %v513_v16  ;;  %v976_v18 = vpop.f32.mrb[18].mxu0 }
 0x111   : > { %v525_v19 = vadd.f32 %v976_v18, %v1342_v21  ;;  %v516_v22 = vpop.f32.mrb[19].mxu0  ;;  %v594_v24 = vmax.f32 %v522_v15, 0.0  ;;  %v683_v15 = vld [vmem:[%s1502_s3 + $0x28] sm:$0xff] }
 0x112   : > { %v517_v23 = vadd.f32 %v1342_v21, %v516_v22  ;;  %v592_v26 = vmax.f32 %v514_v17, 0.0  ;;  %v684_v17 = vld [vmem:[%s1502_s3 + $0x30] sm:$0xff]  ;;  %v687_v22 = vld [vmem:[%s1502_s3 + $0x48] sm:$0xff] }
 0x113   : > { %v595_v25 = vmax.f32 %v525_v19, 0.0  ;;  %v686_v19 = vld [vmem:[%s1502_s3 + $0x40] sm:$0xff] }
 0x114   : > { %v593_v27 = vmax.f32 %v517_v23, 0.0  ;;  %v1069_v23 = vpack.c.bf16 %v687_v22, %v686_v19 }
 0x115   : > { %v1028_v28 = vpack.c.bf16 %v595_v25, %v594_v24  ;;  %v688_v24 = vld [vmem:[%s1502_s3 + $0x50] sm:$0xff]  ;;  %v689_v25 = vld [vmem:[%s1502_s3 + $0x58] sm:$0xff] }
 0x116   : > { %v979_v29 = vpop.f32.mrb[20].mxu0  ;;  %v1024_v30 = vpack.c.bf16 %v593_v27, %v592_v26  ;;  %v1072_v26 = vpack.c.bf16 %v689_v25, %v688_v24  ;;  %v690_v27 = vld [vmem:[%s1502_s3 + $0x60] sm:$0xff] }
 0x117   : > { %v538_v31 = vadd.f32 %v979_v29, %v1342_v21  ;;  %v529_v32 = vpop.f32.mrb[21].mxu0 }
 0x118   : > { %v530_v33 = vadd.f32 %v1342_v21, %v529_v32  ;;  %v980_v35 = vpop.f32.mrb[22].mxu0  ;;  %1025 = vmatprep.subr.bf16.mxu1 %v1024_v30  ;;  %v692_v30 = vld [vmem:[%s1502_s3 + $0x70] sm:$0xff] }
 0x119   : > { %v541_v37 = vadd.f32 %v980_v35, %v1342_v21  ;;  %v532_v38 = vpop.f32.mrb[23].mxu0  ;;  %1027 = vmatpush3.bf16.msra.mxu1 %v1350_v36  ;;  %v598_v40 = vmax.f32 %v538_v31, 0.0  ;;  %v693_v31 = vld [vmem:[%s1502_s3 + $0x78] sm:$0xff] }
 0x11a   : > { %v533_v39 = vadd.f32 %v1342_v21, %v532_v38  ;;  %1029 = vmatprep.subr.bf16.mxu1 %v1028_v28  ;;  %v596_v42 = vmax.f32 %v530_v33, 0.0  ;;  %v691_v28 = vld [vmem:[%s1502_s3 + $0x68] sm:$0xff]  ;;  %v1078_v32 = vpack.c.bf16 %v693_v31, %v692_v30  ;;  %v1210_v33 = vmov 0.0  }
 0x11b   : > { %v599_v41 = vmax.f32 %v541_v37, 0.0  ;;  %v1075_v29 = vpack.c.bf16 %v691_v28, %v690_v27 }
 0x11c   : > { %v597_v43 = vmax.f32 %v533_v39, 0.0  ;;  %v694_v39 = vld [vmem:[%s1503_s4] sm:$0x1] }
 0x11d   : > { %v1036_v44 = vpack.c.bf16 %v599_v41, %v598_v40  ;;  %1031 = vmatpush3.bf16.msra.mxu1 %v1348_v34 }
 0x11e   : > { %v1032_v45 = vpack.c.bf16 %v597_v43, %v596_v42  ;;  %v983_v46 = vpop.f32.mrb[24].mxu0 }
 0x11f   : > { %v554_v47 = vadd.f32 %v983_v46, %v1342_v21  ;;  %v545_v50 = vpop.f32.mrb[25].mxu0 }
 0x120   : > { %v546_v51 = vadd.f32 %v1342_v21, %v545_v50  ;;  %v984_v52 = vpop.f32.mrb[26].mxu0  ;;  %1033 = vmatprep.subr.bf16.mxu1 %v1032_v45 }
 0x121   : > { %v557_v36 = vadd.f32 %v984_v52, %v1342_v21  ;;  %v548_v53 = vpop.f32.mrb[27].mxu0  ;;  %1035 = vmatpush3.bf16.msra.mxu1 %v1358_v49  ;;  %v602_v55 = vmax.f32 %v554_v47, 0.0 }
 0x122   : > { %v549_v54 = vadd.f32 %v1342_v21, %v548_v53  ;;  %1037 = vmatprep.subr.bf16.mxu1 %v1036_v44  ;;  %v600_v34 = vmax.f32 %v546_v51, 0.0 }
 0x123   : > { %v603_v56 = vmax.f32 %v557_v36, 0.0 }
 0x124   : > { %v601_v57 = vmax.f32 %v549_v54, 0.0 }
 0x125   : > { %v1044_v58 = vpack.c.bf16 %v603_v56, %v602_v55  ;;  %1039 = vmatpush3.bf16.msra.mxu1 %v1356_v48 }
 0x126   : > { %v1040_v59 = vpack.c.bf16 %v601_v57, %v600_v34  ;;  %v987_v60 = vpop.f32.mrb[28].mxu0 }
 0x127   : > { %v570_v61 = vadd.f32 %v987_v60, %v1342_v21  ;;  %v561_v0 = vpop.f32.mrb[29].mxu0 }
 0x128   : > { %v562_v1 = vadd.f32 %v1342_v21, %v561_v0  ;;  %v988_v2 = vpop.f32.mrb[30].mxu0  ;;  %1041 = vmatprep.subr.bf16.mxu1 %v1040_v59 }
 0x129   : > { %v573_v49 = vadd.f32 %v988_v2, %v1342_v21  ;;  %v564_v3 = vpop.f32.mrb[31].mxu0  ;;  %1043 = vmatpush3.bf16.msra.mxu1 %v1366_v63  ;;  %v606_v5 = vmax.f32 %v570_v61, 0.0 }
 0x12a   : > { %v565_v4 = vadd.f32 %v1342_v21, %v564_v3  ;;  %1045 = vmatprep.subr.bf16.mxu1 %v1044_v58  ;;  %v604_v48 = vmax.f32 %v562_v1, 0.0  ;;  %v679_v21 = vld [vmem:[%s1502_s3 + $0x8] sm:$0xff] }
 0x12b   : > { %v607_v6 = vmax.f32 %v573_v49, 0.0  ;;  %v1057_v63 = vpack.c.bf16 %v679_v21, %v678_v10 }
 0x12c   : > { %v605_v7 = vmax.f32 %v565_v4, 0.0 }
 0x12d   : > { %v1052_v8 = vpack.c.bf16 %v607_v6, %v606_v5  ;;  %1047 = vmatpush3.bf16.msra.mxu1 %v1364_v62  ;;  %v680_v62 = vld [vmem:[%s1502_s3 + $0x10] sm:$0xff] }
 0x12e   : > { %v1048_v9 = vpack.c.bf16 %v605_v7, %v604_v48 }
 0x130   : > { %1049 = vmatprep.subr.bf16.mxu1 %v1048_v9 }
 0x131   : > { %1051 = vmatpush3.bf16.msra.mxu1 %v1374_v13  ;;  %v681_v13 = vld [vmem:[%s1502_s3 + $0x18] sm:$0xff] }
 0x132   : > { %1053 = vmatprep.subr.bf16.mxu1 %v1052_v8  ;;  %v1060_v14 = vpack.c.bf16 %v681_v13, %v680_v62 }
 0x135   : > { %1055 = vmatpush3.bf16.msra.mxu1 %v1372_v12  ;;  %v682_v12 = vld [vmem:[%s1502_s3 + $0x20] sm:$0xff] }
 0x136   : > { %1056 = vmatprep.subr.bf16.mxu1 %v1208_v11  ;;  %v1063_v16 = vpack.c.bf16 %v683_v15, %v682_v12 }
 0x138   : > { %673 = vmatmul.mubr.f32.vlgmr.msra.gmra.mrb[0].mxu1 %v1207_v20  ;;  %v685_v20 = vld [vmem:[%s1502_s3 + $0x38] sm:$0xff] }
 0x139   : > { %1058 = vmatpush3.bf16.msra.mxu1 %v1057_v63  ;;  %v1066_v18 = vpack.c.bf16 %v685_v20, %v684_v17  ;;  %1021 = vmatprep.mubr.msk.f32.mxu1 %vm1209_vm2, %v1210_v33 }
 0x13a   : > { %1059 = vmatprep.subr.bf16.mxu1 %v1208_v11 }
 0x13d   : > { %1061 = vmatpush3.bf16.msra.mxu1 %v1060_v14 }
 0x13e   : > { %1062 = vmatprep.subr.bf16.mxu1 %v1208_v11 }
 0x141   : > { %1064 = vmatpush3.bf16.msra.mxu1 %v1063_v16 }
 0x142   : > { %1065 = vmatprep.subr.bf16.mxu1 %v1208_v11 }
 0x145   : > { %1067 = vmatpush3.bf16.msra.mxu1 %v1066_v18 }
 0x146   : > { %1068 = vmatprep.subr.bf16.mxu1 %v1208_v11 }
 0x149   : > { %1070 = vmatpush3.bf16.msra.mxu1 %v1069_v23 }
 0x14a   : > { %1071 = vmatprep.subr.bf16.mxu1 %v1208_v11 }
 0x14d   : > { %1073 = vmatpush3.bf16.msra.mxu1 %v1072_v26 }
 0x14e   : > { %1074 = vmatprep.subr.bf16.mxu1 %v1208_v11 }
 0x151   : > { %1076 = vmatpush3.bf16.msra.mxu1 %v1075_v29 }
 0x152   : > { %1077 = vmatprep.subr.bf16.mxu1 %v1208_v11 }
 0x155   : > { %1079 = vmatpush3.bf16.msra.mxu1 %v1078_v32 }
 0x20b   : > { %v931_v35 = vpop.f32.mrb[0].mxu1 }
 0x20c   : > { %v932_v37 = vpop.f32.mrb[1].mxu1 }
 0x20d   : > { %v933_v38 = vadd.f32 %v932_v37, %v931_v35 }
 0x20f   : > { %1022 = vmatmul.mubr.f32.vlgmr.msra.gmra.mrb[2].mxu1 %v933_v38 }
 0x2e2   : > { %v761_v40 = vpop.f32.mrb[2].mxu1 }
 0x2e3   : > { %v762_v41 = vadd.f32 %v761_v40, %v694_v39  ;;  %v1023_v42 = vpop.f32.mrb[3].mxu1 }
 0x2e5   : > { %765 = vst [vmem:[%s216_s6] sm:$0x1] %v762_v41 }
 0x2e6   : > { %1156 = shalt.err (!%p1153_p3)
}
 0x2e7   : > { %s1157_s15 = scalar_lea.hbm %s1457_s10, 16  ;;  %s1161_s23 = scalar_lea.hbm %s1504_s5, 32 }
 0x2e8   : > { %p1158_p4 = scmp.ne.s32.totalorder %s1457_s10, %s1157_s15  ;;  %p1162_p9 = scmp.lt.u32.totalorder %s1457_s10, %s1504_s5 }
 0x2e9   : > { %p1163_p10 = scmp.lt.u32.totalorder %s1161_s23, %s1157_s15  ;;  %p1165_p12 = scmp.lt.u32.totalorder %s1157_s15, %s1457_s10 }
 0x2ea   : > { %p1159_p7 = pnand %p1158_p4, %p1280_p5 }
 0x2eb   : > { %p1164_p11 = por %p1163_p10, %p1162_p9 }
 0x2ec   : > { %p1160_p8 = pneg %p1159_p7 }
 0x2ed   : > { %p1166_p13 = por %p1165_p12, %p1164_p11 }
 0x2ef   : > { %p1167_p0 = pnand %p1166_p13, %p1160_p8 }
 0x2f1   : > { %1170 = shalt.err (!%p1167_p0)
}
 0x2f2   : > { %1081 = dma.vmem_to_hbm [thread:$0]  (%p1280_p5), %s1459_s7, 16, %s1457_s10, %s767_s11  }
 0x2f3 PF: > { %p1087_p1 = scmp.ge.s32.totalorder %s1205_s21, 2  ;;  %s791_s30 = sand.u32 1, %s1193_s18  }
 0x2f4   : > { %s792_s6 = scalar_lea.sflag [#allocation3], %s791_s30 }
 0x2f5   : > { %p1084_p2 = pnand %p1087_p1, %p1284_p6 }
 0x2f7   : > { %1188 = dma.done.wait (!%p1084_p2), %s792_s6, 16  }
 0x2f8   : > { %1190 = vsyncadd (!%p1084_p2), %s792_s6, 4294967280  ;;  %p15_p3 = scmp.ge.s32.totalorder %s1267_s24, 4   ;;  %s1507_s18 = smov %s1197_s19 }
 0x2f9   : > { %s1508_s19 = smov %s1201_s20  ;;  %s1509_s20 = smov %s1278_s27 }
 0x2fa   : > { %s1510_s21 = smov %s1267_s24  ;;  %17 = sbr.rel (!%p15_p3) target bundleno = 3 (0x3), region = 75 }
 0x301   :  { %796 = vsyncpa [#allocation3], 1 }
 0x302   :  { %798 = vsyncpa [#allocation3 + $0x1], 1 }

</bundles_post_ra>
